<compile_context>
chip_gen: v7x
topology: tpu7x:2x2x1
jax: 0.10.0
libtpu: 0.0.40
codegen_flags: <defaults>
</compile_context>

<pallas_src>
import functools
import math

import jax
import jax.numpy as jnp
from jax import lax
from jax.experimental import pallas as pl
from jax.experimental.pallas import tpu as pltpu

_MIB = 1024 * 1024


def _attn_kernel(q_ref, k_ref, v_ref, o_ref, *, scale2, matmul_dtype, exp_dtype):
    # q_ref: (Hb, C, tq), k_ref/v_ref: (Hb, C, T), o_ref: (Hb, C, tq)
    # Fold both scale factors into q once; cast operands to the MXU dtype
    # (bf16 for f32 callers) while keeping f32 accumulation.
    q = (q_ref[...] * scale2).astype(matmul_dtype)
    k = k_ref[...].astype(matmul_dtype)
    v = v_ref[...].astype(matmul_dtype)

    # scores[h, t, s] = sum_c q[h, c, t] * k[h, c, s]
    # contract dim 1 of both, batch dim 0 -> MXU, f32 accumulation, no explicit q.T
    w = lax.dot_general(q, k, (((1,), (1,)), ((0,), (0,))),
                        preferred_element_type=jnp.float32)        # (Hb, tq, T) f32

    # Numerically-stable softmax over keys. The exp optionally runs on the
    # bf16 EUP path (v6e/v7x, ~2x f32 exp throughput — this kernel is EUP-bound
    # at ADM-typical head dims); row-sum / normalization stay in f32.
    w_max = jnp.max(w, axis=-1, keepdims=True)
    w_exp = jnp.exp((w - w_max).astype(exp_dtype))
    w_exp_f32 = w_exp.astype(jnp.float32)
    w_sum = jnp.sum(w_exp_f32, axis=-1, keepdims=True)
    inv = pl.reciprocal(w_sum, approx=False)        # exact; only (Hb, tq, 1) elements
    p = (w_exp_f32 * inv).astype(matmul_dtype)      # feed MXU at its native dtype

    # a[h, c, t] = sum_s v[h, c, s] * p[h, t, s]
    # contract dim 2 of both, batch dim 0 -> MXU, output directly in (C, tq) layout
    a = lax.dot_general(v, p, (((2,), (2,)), ((0,), (0,))),
                        preferred_element_type=jnp.float32)        # (Hb, C, tq) f32
    o_ref[...] = a.astype(o_ref.dtype)


def _tpu_generation_and_vmem():
    """Best-effort (generation, physical VMEM bytes) query; conservative fallback."""
    gen = 0
    vmem = None
    try:
        kind = jax.devices()[0].device_kind.lower()
        for g in (7, 6, 5, 4):
            if f"v{g}" in kind:
                gen = g
                break
    except Exception:
        pass
    try:
        info = pltpu.get_tpu_info()
        cap = getattr(info, "vmem_capacity_bytes", None)
        if cap:
            vmem = int(cap)
    except Exception:
        pass
    if vmem is None:
        vmem = 64 * _MIB if gen >= 7 else 128 * _MIB
    return gen, vmem


def _plan_tiles(B, ch, T, itemsize, *, gen, vmem_bytes):
    """Generation-aware tiling: pick (heads_per_block, query_tile, single_buffer_kv,
    vmem_limit_bytes) so the per-step working set stays within ~65% of the VMEM
    limit we request from Mosaic."""
    if gen >= 7:
        vmem_limit = 48 * _MIB      # v7x: 64 MiB physical per TensorCore
    elif gen == 6:
        vmem_limit = 100 * _MIB     # v6e: 128 MiB physical, 32 MiB scoped default
    elif gen == 5:
        vmem_limit = 96 * _MIB      # v5e: 128 MiB physical, 16 MiB scoped default
    else:
        vmem_limit = None           # unknown / older chip: keep the scoped default
    if vmem_limit is not None:
        vmem_limit = min(vmem_limit, int(vmem_bytes * 0.8))
    step_budget = int(vmem_limit * 0.65) if vmem_limit is not None else 10 * _MIB
    score_budget = step_budget // 2

    # Query tile: largest divisor of T that is a multiple of 128 (lane-dense,
    # unmasked vst on the output path) whose f32 score temporaries fit the
    # budget; ragged / small T falls back to the full extent (a block equal to
    # the full dim is always legal).
    if T % 128 == 0:
        tq = 128
        for d in sorted((d for d in range(128, T + 1, 128) if T % d == 0),
                        reverse=True):
            if 3 * d * T * 4 <= score_budget:
                tq = d
                break
    else:
        tq = T

    # v7x: single-buffer the full-T K/V blocks — their block index only changes
    # once per head block, so the exposed DMA is amortized over T//tq steps and
    # the reclaimed VMEM buys a larger head block / query tile.
    single_buffer_kv = (gen >= 7) and (T // tq > 1)
    kv_bufs = 1 if single_buffer_kv else 2

    def step_bytes(hb):
        scores = 3 * hb * tq * T * 4                      # w / exp / p f32 temps
        kv_tiles = kv_bufs * 2 * hb * ch * T * itemsize   # k, v blocks
        qo_tiles = 2 * 2 * hb * ch * tq * itemsize        # q, out double-buffered
        return scores + kv_tiles + qo_tiles

    # Batch heads per grid step to amortize the ~0.35 us per-step overhead on
    # small (C, T) heads, while keeping the per-step working set bounded.
    hb = 1
    while hb * 2 <= B and B % (hb * 2) == 0 and step_bytes(hb * 2) <= step_budget:
        hb *= 2
    # TODO(synk): for very large T where even hb=1, tq=128 blows the budget, add a
    # flash-style online-softmax loop over key tiles to break the O(T) VMEM scaling.
    return hb, tq, single_buffer_kv, vmem_limit


def qkv_attention_legacy(qkv, n_heads, *, heads_per_block=None, q_tile=None,
                         matmul_dtype=None, exp_dtype=None, vmem_limit_bytes=None):
    """Pallas equivalent of QKVAttentionLegacy.forward.

    qkv: [N, H*3*C, T]  ->  returns [N, H*C, T]
    """
    bs, width, length = qkv.shape
    assert width % (3 * n_heads) == 0
    ch = width // (3 * n_heads)
    scale = 1.0 / math.sqrt(math.sqrt(ch))
    scale2 = scale * scale            # == 1/sqrt(ch); applied once, to q only

    B = bs * n_heads
    # Free, contiguous reshape: no HBM copy. q/k/v are selected purely by the
    # BlockSpec index_maps on the size-3 axis.
    qkv_r = qkv.reshape(B, 3, ch, length)

    gen, vmem_bytes = _tpu_generation_and_vmem()
    hb, tq, single_buffer_kv, auto_limit = _plan_tiles(
        B, ch, length, qkv.dtype.itemsize, gen=gen, vmem_bytes=vmem_bytes)
    if heads_per_block is not None:
        hb = heads_per_block
    if q_tile is not None:
        tq = q_tile
    if vmem_limit_bytes is None:
        vmem_limit_bytes = auto_limit
    assert B % hb == 0 and length % tq == 0
    assert tq == length or tq % 128 == 0, "query tile must be lane-dense or full-T"

    if matmul_dtype is None:
        # f32 MXU operands cost 3-6 bf16 passes (and v7x has no f32/int MXU path):
        # cast matmul operands to bf16, keep f32 accumulation & f32 softmax stats.
        matmul_dtype = jnp.bfloat16 if qkv.dtype == jnp.float32 else qkv.dtype
    if exp_dtype is None:
        # bf16 EUP exp exists on v6e/v7x only; v5e has no bf16 EUP/VPU path.
        exp_dtype = jnp.bfloat16 if gen >= 6 else jnp.float32

    grid = (B // hb, length // tq)

    # Block last-two dims are (ch, tq) / (ch, T): ch spans the full dim and tq is
    # either a multiple of 128 or the full T, satisfying the (8, 128) rule.
    kv_kwargs = {"pipeline_mode": pl.Buffered(1)} if single_buffer_kv else {}
    q_spec = pl.BlockSpec((hb, None, ch, tq), lambda h, t: (h, 0, 0, t))
    k_spec = pl.BlockSpec((hb, None, ch, length), lambda h, t: (h, 1, 0, 0), **kv_kwargs)
    v_spec = pl.BlockSpec((hb, None, ch, length), lambda h, t: (h, 2, 0, 0), **kv_kwargs)
    o_spec = pl.BlockSpec((hb, ch, tq), lambda h, t: (h, 0, t))

    out = pl.pallas_call(
        functools.partial(_attn_kernel, scale2=scale2,
                          matmul_dtype=matmul_dtype, exp_dtype=exp_dtype),
        out_shape=jax.ShapeDtypeStruct((B, ch, length), qkv.dtype),
        grid_spec=pltpu.PrefetchScalarGridSpec(
            num_scalar_prefetch=0,
            grid=grid,
            in_specs=[q_spec, k_spec, v_spec],
            out_specs=o_spec,
        ),
        compiler_params=pltpu.CompilerParams(
            # Head axis parallel (v7x megacore shards disjoint K/V streams),
            # query-tile axis arbitrary (keeps the full-T K/V block resident,
            # no duplicated K/V DMA across cores). No-op on 1-TC chips.
            dimension_semantics=("parallel", "arbitrary"),
            vmem_limit_bytes=vmem_limit_bytes,
        ),
    )(qkv_r, qkv_r, qkv_r)

    # Free, contiguous reshape back to [N, H*C, T].
    return out.reshape(bs, n_heads * ch, length)


def _reference(qkv, n_heads):
    """Pure-JAX reference mirroring the PyTorch forward, for a correctness check."""
    bs, width, length = qkv.shape
    ch = width // (3 * n_heads)
    scale = 1.0 / math.sqrt(math.sqrt(ch))
    qkv_h = qkv.reshape(bs * n_heads, 3 * ch, length)
    q, k, v = qkv_h[:, :ch], qkv_h[:, ch:2 * ch], qkv_h[:, 2 * ch:]
    w = jnp.einsum("bct,bcs->bts", q * scale, k * scale)
    w = jax.nn.softmax(w.astype(jnp.float32), axis=-1).astype(w.dtype)
    a = jnp.einsum("bts,bcs->bct", w, v)
    return a.reshape(bs, -1, length)


if __name__ == "__main__":
    # QKVAttentionLegacy has no learnable parameters (only n_heads); build a
    # deterministic qkv input: N=2, H=2, C=8, T=16  ->  [2, 48, 16].
    n_heads = 2
    N, C, T = 2, 8, 16
    key = jax.random.PRNGKey(0)
    qkv = jax.random.normal(key, (N, n_heads * 3 * C, T), dtype=jnp.float32)

    out = qkv_attention_legacy(qkv, n_heads)
    out = jax.block_until_ready(out)

    ref = _reference(qkv, n_heads)
    assert out.shape == (N, n_heads * C, T), out.shape
    # bf16 MXU operands (and, on v6e/v7x, bf16 EUP exp) vs the exact-f32 PyTorch-style
    # reference => flash-attention-grade agreement, not bit-exact. Documented, widened
    # tolerances; the mean-abs check guards against gross (indexing/scale) errors.
    diff = jnp.abs(out - ref)
    max_diff = float(jnp.max(diff))
    mean_diff = float(jnp.mean(diff))
    assert jnp.allclose(out, ref, atol=1.5e-1, rtol=1.5e-1), f"max mismatch: {max_diff}"
    assert mean_diff < 3e-2, f"mean mismatch: {mean_diff}"

    print("KERNEL_OK")
</pallas_src>

<mosaic_0001>
module attributes {stable_mosaic.version = 11 : i64} {
  func.func @_attn_kernel(%arg0: i32, %arg1: i32, %arg2: memref<4x1x8x16xf32, #tpu.memory_space<vmem>>, %arg3: memref<4x1x8x16xf32, #tpu.memory_space<vmem>>, %arg4: memref<4x1x8x16xf32, #tpu.memory_space<vmem>>, %arg5: memref<4x8x16xf32, #tpu.memory_space<vmem>>) attributes {dimension_semantics = [#tpu.dimension_semantics<parallel>, #tpu.dimension_semantics<arbitrary>], iteration_bounds = array<i64: 1, 1>, scalar_prefetch = 0 : i64, scratch_operands = 0 : i64, tpu.core_type = #tpu.core_type<tc>, window_params = [{transform_indices = @transform_0, window_bounds = array<i64: 4, 1, 8, 16>}, {transform_indices = @transform_1, window_bounds = array<i64: 4, 1, 8, 16>}, {transform_indices = @transform_2, window_bounds = array<i64: 4, 1, 8, 16>}, {transform_indices = @transform_3, window_bounds = array<i64: 4, 8, 16>}]} {
    %c0 = arith.constant 0 : index
    %c0_0 = arith.constant 0 : index
    %c0_1 = arith.constant 0 : index
    %c0_2 = arith.constant 0 : index
    %0 = vector.load %arg2[%c0, %c0_0, %c0_1, %c0_2] : memref<4x1x8x16xf32, #tpu.memory_space<vmem>>, vector<4x1x8x16xf32>
    %1 = vector.shape_cast %0 : vector<4x1x8x16xf32> to vector<4x8x16xf32>
    %cst = arith.constant 0.353553385 : f32
    %2 = vector.broadcast %cst : f32 to vector<4x8x16xf32>
    %3 = arith.mulf %1, %2 : vector<4x8x16xf32>
    %4 = arith.truncf %3 : vector<4x8x16xf32> to vector<4x8x16xbf16>
    %c0_3 = arith.constant 0 : index
    %c0_4 = arith.constant 0 : index
    %c0_5 = arith.constant 0 : index
    %c0_6 = arith.constant 0 : index
    %5 = vector.load %arg3[%c0_3, %c0_4, %c0_5, %c0_6] : memref<4x1x8x16xf32, #tpu.memory_space<vmem>>, vector<4x1x8x16xf32>
    %6 = vector.shape_cast %5 : vector<4x1x8x16xf32> to vector<4x8x16xf32>
    %7 = arith.truncf %6 : vector<4x8x16xf32> to vector<4x8x16xbf16>
    %c0_7 = arith.constant 0 : index
    %c0_8 = arith.constant 0 : index
    %c0_9 = arith.constant 0 : index
    %c0_10 = arith.constant 0 : index
    %8 = vector.load %arg4[%c0_7, %c0_8, %c0_9, %c0_10] : memref<4x1x8x16xf32, #tpu.memory_space<vmem>>, vector<4x1x8x16xf32>
    %9 = vector.shape_cast %8 : vector<4x1x8x16xf32> to vector<4x8x16xf32>
    %10 = arith.truncf %9 : vector<4x8x16xf32> to vector<4x8x16xbf16>
    %cst_11 = arith.constant dense<0.000000e+00> : vector<4x16x16xf32>
    %11 = tpu.matmul %4, %7, %cst_11 {dimension_numbers = #tpu.dot_dimension_numbers<[1], [1], [2], [2], [0, 0, 0, 2, 1, 2], [0], [0]>} : vector<4x8x16xbf16>, vector<4x8x16xbf16>, vector<4x16x16xf32> -> vector<4x16x16xf32>
    %cst_12 = arith.constant dense<0xFF800000> : vector<4x16xf32>
    %12 = vector.multi_reduction <maximumf>, %11, %cst_12 [2] : vector<4x16x16xf32> to vector<4x16xf32>
    %13 = vector.shape_cast %12 : vector<4x16xf32> to vector<4x16x1xf32>
    %14 = vector.broadcast %13 : vector<4x16x1xf32> to vector<4x16x16xf32>
    %15 = arith.subf %11, %14 : vector<4x16x16xf32>
    %16 = math.exp %15 : vector<4x16x16xf32>
    %cst_13 = arith.constant dense<0.000000e+00> : vector<4x16xf32>
    %17 = vector.multi_reduction <add>, %16, %cst_13 [2] : vector<4x16x16xf32> to vector<4x16xf32>
    %18 = vector.shape_cast %17 : vector<4x16xf32> to vector<4x16x1xf32>
    %19 = tpu.reciprocal %18 : vector<4x16x1xf32> -> vector<4x16x1xf32>
    %20 = vector.broadcast %19 : vector<4x16x1xf32> to vector<4x16x16xf32>
    %21 = arith.mulf %16, %20 : vector<4x16x16xf32>
    %22 = arith.truncf %21 : vector<4x16x16xf32> to vector<4x16x16xbf16>
    %cst_14 = arith.constant dense<0.000000e+00> : vector<4x8x16xf32>
    %23 = tpu.matmul %10, %22, %cst_14 {dimension_numbers = #tpu.dot_dimension_numbers<[2], [2], [1], [1], [0, 0, 0, 1, 1, 1], [0], [0]>} : vector<4x8x16xbf16>, vector<4x16x16xbf16>, vector<4x8x16xf32> -> vector<4x8x16xf32>
    %c0_15 = arith.constant 0 : index
    %c0_16 = arith.constant 0 : index
    %c0_17 = arith.constant 0 : index
    %24 = vector.load %arg5[%c0_15, %c0_16, %c0_17] : memref<4x8x16xf32, #tpu.memory_space<vmem>>, vector<4x8x16xf32>
    tpu.vector_store %arg5[%c0_15, %c0_16, %c0_17], %23 {strides = array<i32>} : memref<4x8x16xf32, #tpu.memory_space<vmem>>, vector<4x8x16xf32>,
    return
  }
  func.func @transform_0(%arg0: i32, %arg1: i32) -> (i32, i32, i32, i32) {
    %c0_i32 = arith.constant 0 : i32
    %c0_i32_0 = arith.constant 0 : i32
    %c0_i32_1 = arith.constant 0 : i32
    return %arg0, %c0_i32, %c0_i32_0, %arg1 : i32, i32, i32, i32
  }
  func.func @transform_1(%arg0: i32, %arg1: i32) -> (i32, i32, i32, i32) {
    %c1_i32 = arith.constant 1 : i32
    %c0_i32 = arith.constant 0 : i32
    %c0_i32_0 = arith.constant 0 : i32
    %c0_i32_1 = arith.constant 0 : i32
    return %arg0, %c1_i32, %c0_i32, %c0_i32_0 : i32, i32, i32, i32
  }
  func.func @transform_2(%arg0: i32, %arg1: i32) -> (i32, i32, i32, i32) {
    %c2_i32 = arith.constant 2 : i32
    %c0_i32 = arith.constant 0 : i32
    %c0_i32_0 = arith.constant 0 : i32
    %c0_i32_1 = arith.constant 0 : i32
    return %arg0, %c2_i32, %c0_i32, %c0_i32_0 : i32, i32, i32, i32
  }
  func.func @transform_3(%arg0: i32, %arg1: i32) -> (i32, i32, i32) {
    %c0_i32 = arith.constant 0 : i32
    %c0_i32_0 = arith.constant 0 : i32
    return %arg0, %c0_i32, %arg1 : i32, i32, i32
  }
}

</mosaic_0001>

<bundles_post_ra>
// kernel: tpu_custom_call.1
= control target key start
LH: loop header
LB: loop body
LE: loop exit
PB: predicated region body
PF: predicated region fallthrough
CT: control target
= control target key end

     0   :  { %8 = vsyncpa [#allocation3], 0  ;;  %s1019_s0 = inlined_call_operand.hbm [shape: f32[4,3,8,16], index: 0, kind: input, shape index: {}]   ;;  %s1020_s1 = inlined_call_operand.hbm [shape: f32[4,3,8,16], index: 1, kind: input, shape index: {}]   ;;  %s1021_s2 = inlined_call_operand.hbm [shape: f32[4,3,8,16], index: 2, kind: input, shape index: {}]   ;;  %s1022_s3 = inlined_call_operand.hbm [shape: f32[4,8,16], index: 3, kind: output, shape index: {}]  }
   0x1   :  { %9 = vsyncpa [#allocation6], 0 }
   0x2   :  { %10 = vsyncpa [#allocation4], 0  ;;  %s886_s14 = scalar_lea.hbm %s1020_s1, 128  ;;  %s854_s15 = smov [#allocation5]  }
   0x3   :  { %s29_s16 = sshll.u32 %s854_s15, 4  ;;  %s855_s17 = smov [#allocation2]   ;;  %s30_s16 = int_to_ptr.vmem [resolvable:$true] %s29_s16 }
   0x4   :  { %s16_s18 = sshll.u32 %s855_s17, 4  ;;  %s778_s21 = scalar_lea.hbm %s1020_s1, 640  ;;  %s888_s18 = int_to_ptr.vmem [resolvable:$true] %s16_s18 }
   0x5   :  { %p755_p0 = scmp.ne.s32.totalorder %s886_s14, %s778_s21  ;;  %s756_s24 = scalar_lea.hbm %s1020_s1, 1536 }
   0x6   :  { %p757_p1 = scmp.lt.u32.totalorder %s886_s14, %s1020_s1  ;;  %p758_p2 = scmp.lt.u32.totalorder %s756_s24, %s778_s21 }
   0x7   :  { %p760_p4 = scmp.lt.u32.totalorder %s778_s21, %s886_s14 }
   0x8   :  { %p759_p3 = por %p758_p2, %p757_p1 }
   0xa   :  { %p761_p5 = por %p760_p4, %p759_p3 }
   0xc   :  { %p762_p6 = pnand %p761_p5, %p755_p0 }
   0xe   :  { %765 = shalt.err (!%p762_p6)
}
   0xf   :  { %s766_s27 = scalar_lea.vmem %s30_s16, 512  ;;  %p771_p8 = scmp.lt.s32.totalorder %s30_s16, %s30_s16 }
  0x10   :  { %p767_p7 = scmp.ne.s32.totalorder %s30_s16, %s766_s27  ;;  %p772_p9 = scmp.lt.s32.totalorder %s766_s27, %s766_s27 }
  0x12   :  { %p773_p10 = por %p772_p9, %p771_p8 }
  0x14   :  { %p774_p11 = pnand %p773_p10, %p767_p7 }
  0x16   :  { %777 = shalt.err (!%p774_p11)
}
  0x17   :  { %s856_s28 = smov 384   ;;  %s857_s29 = smov 128  }
  0x18   :  { %s858_s30 = smov 8   ;;  %s779_s5 = scalar_lea.hbm %s1019_s0, 512 }
  0x19   :  { %35 = dma.hbm_to_vmem [thread:$0]  %s886_s14, 512, %s30_s16, [#allocation6], %s856_s28, %s857_s29, %s858_s30  }
  0x1a   :  { %p780_p12 = scmp.ne.s32.totalorder %s1019_s0, %s779_s5  ;;  %s781_s10 = scalar_lea.hbm %s1019_s0, 1536 }
  0x1b   :  { %p782_p13 = scmp.lt.u32.totalorder %s781_s10, %s779_s5  ;;  %p783_p0 = scmp.lt.u32.totalorder %s779_s5, %s1019_s0 }
  0x1d   :  { %p784_p1 = por %p783_p0, %p782_p13 }
  0x1f   :  { %p785_p2 = pnand %p784_p1, %p780_p12 }
  0x21   :  { %788 = shalt.err (!%p785_p2)
}
  0x22   :  { %s789_s13 = scalar_lea.vmem %s888_s18, 512  ;;  %p794_p4 = scmp.lt.s32.totalorder %s888_s18, %s888_s18 }
  0x23   :  { %p790_p3 = scmp.ne.s32.totalorder %s888_s18, %s789_s13  ;;  %p795_p5 = scmp.lt.s32.totalorder %s789_s13, %s789_s13 }
  0x25   :  { %p796_p6 = por %p795_p5, %p794_p4 }
  0x27   :  { %p797_p7 = pnand %p796_p6, %p790_p3 }
  0x29   :  { %800 = shalt.err (!%p797_p7)
}
  0x2a   :  { %22 = dma.hbm_to_vmem [thread:$0]  %s1019_s0, 512, %s888_s18, [#allocation3], %s856_s28, %s857_s29, %s858_s30  }
  0x2b   :  { %s41_s19 = scalar_lea.hbm %s1021_s2, 256  ;;  %s859_s20 = smov [#allocation7]  }
  0x2c   :  { %s42_s21 = sshll.u32 %s859_s20, 4  ;;  %s825_s24 = scalar_lea.hbm %s1021_s2, 768  ;;  %s43_s21 = int_to_ptr.vmem [resolvable:$true] %s42_s21 }
  0x2d   :  { %p802_p8 = scmp.ne.s32.totalorder %s41_s19, %s825_s24  ;;  %s803_s27 = scalar_lea.hbm %s1021_s2, 1536 }
  0x2e   :  { %p804_p9 = scmp.lt.u32.totalorder %s41_s19, %s1021_s2  ;;  %p805_p10 = scmp.lt.u32.totalorder %s803_s27, %s825_s24 }
  0x2f   :  { %p807_p12 = scmp.lt.u32.totalorder %s825_s24, %s41_s19 }
  0x30   :  { %p806_p11 = por %p805_p10, %p804_p9 }
  0x32   :  { %p808_p13 = por %p807_p12, %p806_p11 }
  0x34   :  { %p809_p0 = pnand %p808_p13, %p802_p8 }
  0x36   :  { %812 = shalt.err (!%p809_p0)
}
  0x37   :  { %s813_s0 = scalar_lea.vmem %s43_s21, 512  ;;  %p818_p2 = scmp.lt.s32.totalorder %s43_s21, %s43_s21 }
  0x38   :  { %p814_p1 = scmp.ne.s32.totalorder %s43_s21, %s813_s0  ;;  %p819_p3 = scmp.lt.s32.totalorder %s813_s0, %s813_s0 }
  0x3a   :  { %p820_p4 = por %p819_p3, %p818_p2 }
  0x3c   :  { %p821_p5 = pnand %p820_p4, %p814_p1 }
  0x3e   :  { %824 = shalt.err (!%p821_p5)
}
  0x3f   :  { %48 = dma.hbm_to_vmem [thread:$0]  %s41_s19, 512, %s43_s21, [#allocation6], %s856_s28, %s857_s29, %s858_s30  }
  0x40   :  { %848 = dma.done.wait [#allocation3], 512  }
  0x41   :  { %849 = vsyncadd [#allocation3], 4294966784 }
  0x42   :  { %850 = dma.done.wait [#allocation6], 1024  }
  0x43   :  { %851 = vsyncadd [#allocation6], 4294966272  ;;  %v860_v0 = vmov 0.0   ;;  %vm861_vm0 = vmmov 0   ;;  %v59_v1 = vld [vmem:[#allocation2] sm:$0xff]  ;;  %v60_v2 = vld [vmem:[#allocation2 + $0x8] sm:$0xff] }
  0x44   :  { %664 = vmatprep.subr.bf16.mxu0 %v860_v0  ;;  %666 = vmatprep.mubr.msk.bf16.mxu0 %vm861_vm0, %v860_v0  ;;  %v61_v3 = vld [vmem:[#allocation2 + $0x10] sm:$0xff]  ;;  %v63_v4 = vmul.f32 0.35355338, %v59_v1  ;;  %v64_v5 = vmul.f32 0.35355338, %v60_v2  ;;  %v62_v7 = vld [vmem:[#allocation2 + $0x18] sm:$0xff] }
  0x45   :  { %670 = vmatprep.subr.bf16.mxu1 %v860_v0  ;;  %672 = vmatprep.mubr.msk.bf16.mxu1 %vm861_vm0, %v860_v0  ;;  %v65_v6 = vmul.f32 0.35355338, %v61_v3  ;;  %v71_v8 = vld [vmem:[#allocation5] sm:$0xff]  ;;  %v72_v9 = vld [vmem:[#allocation5 + $0x8] sm:$0xff]  ;;  %v66_v12 = vmul.f32 0.35355338, %v62_v7 }
  0x46   :  { %v67_v10 = vpack.c.bf16 %v63_v4, %v63_v4  ;;  %vm107_vm1 = vcmask 1043456   ;;  %v75_v13 = vpack.c.bf16 %v71_v8, %v71_v8  ;;  %v76_v14 = vpack.c.bf16 %v72_v9, %v72_v9  ;;  %v73_v19 = vld [vmem:[#allocation5 + $0x10] sm:$0xff]  ;;  %v74_v21 = vld [vmem:[#allocation5 + $0x18] sm:$0xff]  ;;  %s862_s2 = smov [#allocation8]  }
  0x47   :  { %v69_v11 = vpack.c.bf16 %v65_v6, %v65_v6  ;;  %v68_v15 = vpack.c.bf16 %v64_v5, %v64_v5  ;;  %v70_v16 = vpack.c.bf16 %v66_v12, %v66_v12  ;;  %v77_v20 = vpack.c.bf16 %v73_v19, %v73_v19  ;;  %s627_s18 = sshll.u32 %s862_s2, 4  ;;  %s628_s18 = int_to_ptr.vmem [resolvable:$true] %s627_s18 }
  0x48   :  { %87 = vxpose.xlu0.c.b16.start.end [1/1] (short) (narrow) %v67_v10, 16  ;;  %v109_v17 = vsel %vm107_vm1, %v75_v13, 0  ;;  %v172_v18 = vsel %vm107_vm1, %v76_v14, 0  ;;  %vm103_vm2 = vcmask 64512   ;;  %v78_v23 = vpack.c.bf16 %v74_v21, %v74_v21  ;;  %s826_s28 = scalar_lea.vmem %s628_s18, 512  ;;  %p831_p7 = scmp.lt.s32.totalorder %s628_s18, %s628_s18 }
  0x49   :  { %215 = vxpose.xlu1.c.b16.start.end [1/1] (short) (narrow) %v69_v11, 16  ;;  %665 = vmatpush3.bf16.msra.mxu0 %v109_v17  ;;  %v235_v22 = vsel %vm107_vm1, %v77_v20, 0  ;;  %vm341_vm3 = vcmask 130048   ;;  %p827_p6 = scmp.ne.s32.totalorder %s628_s18, %s826_s28  ;;  %p832_p8 = scmp.lt.s32.totalorder %s826_s28, %s826_s28 }
  0x4a   :  { %671 = vmatpush3.bf16.msra.mxu1 %v172_v18  ;;  %676 = vmatprep.subr.bf16.mxu0 %v860_v0  ;;  %v298_v25 = vsel %vm107_vm1, %v78_v23, 0 }
  0x4b   :  { %682 = vmatprep.subr.bf16.mxu1 %v860_v0  ;;  %p833_p9 = por %p832_p8, %p831_p7 }
  0x4c   :  { %152 = vxpose.xlu0.c.b16.start.end [1/1] (short) (narrow) %v68_v15, 16 }
  0x4d   :  { %278 = vxpose.xlu1.c.b16.start.end [1/1] (short) (narrow) %v70_v16, 16  ;;  %p834_p10 = pnand %p833_p9, %p827_p6 }
  0xae   :  { %v95_v24 = vpop.trf.xlu0 }
  0xaf   :  { %667 = vmatmul.mubr.msk.bf16.vlgmr.msra.gmra.mrb[0].mxu0 %vm103_vm2, %v95_v24  ;;  %v223_v27 = vpop.trf.xlu1 }
  0xb0   :  { %677 = vmatpush3.bf16.msra.mxu0 %v235_v22  ;;  %678 = vmatprep.mubr.msk.bf16.mxu0 %vm861_vm0, %v860_v0 }
  0xb1   :  { %688 = vmatprep.subr.bf16.mxu0 %v860_v0 }
  0xb2   :  { %v160_v26 = vpop.trf.xlu0 }
  0xb3   :  { %673 = vmatmul.mubr.msk.bf16.vlgmr.msra.gmra.mrb[0].mxu1 %vm103_vm2, %v160_v26  ;;  %v286_v28 = vpop.trf.xlu1 }
  0xb4   :  { %683 = vmatpush3.bf16.msra.mxu1 %v298_v25  ;;  %684 = vmatprep.mubr.msk.bf16.mxu1 %vm861_vm0, %v860_v0 }
  0xb5   :  { %694 = vmatprep.subr.bf16.mxu1 %v860_v0 }
  0xb7   :  { %679 = vmatmul.mubr.msk.bf16.vlgmr.msra.gmra.mrb[4].mxu0 %vm103_vm2, %v223_v27 }
  0xb8   :  { %690 = vmatprep.mubr.msk.bf16.mxu0 %vm861_vm0, %v860_v0 }
  0xbb   :  { %685 = vmatmul.mubr.msk.bf16.vlgmr.msra.gmra.mrb[4].mxu1 %vm103_vm2, %v286_v28 }
  0xbc   :  { %696 = vmatprep.mubr.msk.bf16.mxu1 %vm861_vm0, %v860_v0 }
 0x182   :  { %v145_v29 = vpop.f32.mrb[0].mxu0 }
 0x183   :  { %v668_v30 = vpop.f32.mrb[1].mxu0  ;;  %v342_v31 = vsel %vm341_vm3, %v145_v29, -inf }
 0x184   :  { %343 = vmax.xlane.f32.xlu0 %v342_v31  ;;  %v148_v32 = vpop.f32.mrb[2].mxu0 }
 0x185   :  { %v669_v33 = vpop.f32.mrb[3].mxu0  ;;  %v345_v34 = vsel %vm341_vm3, %v148_v32, -inf }
 0x186   :  { %346 = vmax.xlane.f32.xlu1 %v345_v34  ;;  %v208_v35 = vpop.f32.mrb[0].mxu1 }
 0x187   :  { %v674_v36 = vpop.f32.mrb[1].mxu1  ;;  %v348_v37 = vsel %vm341_vm3, %v208_v35, -inf }
 0x188   :  { %349 = vmax.xlane.f32.xlu0 %v348_v37  ;;  %v211_v38 = vpop.f32.mrb[2].mxu1 }
 0x189   :  { %v675_v39 = vpop.f32.mrb[3].mxu1  ;;  %v351_v40 = vsel %vm341_vm3, %v211_v38, -inf }
 0x18a   :  { %v271_v41 = vpop.f32.mrb[4].mxu0  ;;  %352 = vmax.xlane.f32.xlu1 %v351_v40 }
 0x18b   :  { %v680_v42 = vpop.f32.mrb[5].mxu0  ;;  %v354_v43 = vsel %vm341_vm3, %v271_v41, -inf }
 0x18c   :  { %v274_v44 = vpop.f32.mrb[6].mxu0  ;;  %355 = vmax.xlane.f32.xlu0 %v354_v43 }
 0x18d   :  { %v681_v45 = vpop.f32.mrb[7].mxu0  ;;  %v357_v46 = vsel %vm341_vm3, %v274_v44, -inf }
 0x18e   :  { %358 = vmax.xlane.f32.xlu1 %v357_v46  ;;  %v334_v47 = vpop.f32.mrb[4].mxu1 }
 0x18f   :  { %v686_v48 = vpop.f32.mrb[5].mxu1  ;;  %v360_v49 = vsel %vm341_vm3, %v334_v47, -inf }
 0x190   :  { %361 = vmax.xlane.f32.xlu0 %v360_v49  ;;  %v337_v50 = vpop.f32.mrb[6].mxu1  ;;  %v79_v49 = vld [vmem:[#allocation7] sm:$0xff] }
 0x191   :  { %v687_v51 = vpop.f32.mrb[7].mxu1  ;;  %v363_v52 = vsel %vm341_vm3, %v337_v50, -inf }
 0x192   :  { %364 = vmax.xlane.f32.xlu1 %v363_v52 }
 0x211   :  { %v344_v53 = vpop.xlane.xlu0 %343 }
 0x212   :  { %v366_v54 = vsub.f32 %v145_v29, %v344_v53  ;;  %v83_v53 = vpack.c.bf16 %v79_v49, %v79_v49 }
 0x213   :  { %v347_v55 = vpop.xlane.xlu1 %346 }
 0x214   :  { %v374_v56 = vmul.f32 1.442695, %v366_v54  ;;  %v367_v57 = vsub.f32 %v148_v32, %v347_v55 }
 0x215   :  { %v350_v58 = vpop.xlane.xlu0 %349 }
 0x216   :  { %722 = vpow2.f32 %v374_v56  ;;  %v376_v59 = vmul.f32 1.442695, %v367_v57  ;;  %v368_v60 = vsub.f32 %v208_v35, %v350_v58  ;;  %v80_v57 = vld [vmem:[#allocation7 + $0x8] sm:$0xff] }
 0x217   :  { %v353_v61 = vpop.xlane.xlu1 %352 }
 0x218   :  { %724 = vpow2.f32 %v376_v59  ;;  %v378_v62 = vmul.f32 1.442695, %v368_v60  ;;  %v369_v63 = vsub.f32 %v211_v38, %v353_v61  ;;  %v84_v61 = vpack.c.bf16 %v80_v57, %v80_v57 }
 0x219   :  { %v356_v1 = vpop.xlane.xlu0 %355 }
 0x21a   :  { %726 = vpow2.f32 %v378_v62  ;;  %v380_v2 = vmul.f32 1.442695, %v369_v63  ;;  %v370_v3 = vsub.f32 %v271_v41, %v356_v1  ;;  %v81_v1 = vld [vmem:[#allocation7 + $0x10] sm:$0xff] }
 0x21b   :  { %v359_v4 = vpop.xlane.xlu1 %358 }
 0x21c   :  { %728 = vpow2.f32 %v380_v2  ;;  %v382_v5 = vmul.f32 1.442695, %v370_v3  ;;  %v371_v6 = vsub.f32 %v274_v44, %v359_v4  ;;  %v85_v4 = vpack.c.bf16 %v81_v1, %v81_v1 }
 0x21d   :  { %v362_v7 = vpop.xlane.xlu0 %361 }
 0x21e   :  { %730 = vpow2.f32 %v382_v5  ;;  %v384_v8 = vmul.f32 1.442695, %v371_v6  ;;  %v372_v9 = vsub.f32 %v334_v47, %v362_v7  ;;  %v82_v5 = vld [vmem:[#allocation7 + $0x18] sm:$0xff] }
 0x21f   :  { %v365_v10 = vpop.xlane.xlu1 %364  ;;  %v86_v6 = vpack.c.bf16 %v82_v5, %v82_v5 }
 0x220   :  { %v723_v11 = vpop.eup %722  ;;  %732 = vpow2.f32 %v384_v8  ;;  %v386_v12 = vmul.f32 1.442695, %v372_v9  ;;  %v373_v13 = vsub.f32 %v337_v50, %v365_v10 }
 0x221   :  { %v390_v14 = vsel %vm341_vm3, %v723_v11, 0.0 }
 0x222   :  { %v725_v15 = vpop.eup %724  ;;  %734 = vpow2.f32 %v386_v12  ;;  %v388_v16 = vmul.f32 1.442695, %v373_v13  ;;  %391 = vadd.xlane.f32.xlu0 %v390_v14 }
 0x223   :  { %v393_v17 = vsel %vm341_vm3, %v725_v15, 0.0 }
 0x224   :  { %v727_v18 = vpop.eup %726  ;;  %736 = vpow2.f32 %v388_v16  ;;  %394 = vadd.xlane.f32.xlu1 %v393_v17 }
 0x225   :  { %v396_v19 = vsel %vm341_vm3, %v727_v18, 0.0 }
 0x226   :  { %v729_v20 = vpop.eup %728  ;;  %397 = vadd.xlane.f32.xlu0 %v396_v19 }
 0x227   :  { %v399_v21 = vsel %vm341_vm3, %v729_v20, 0.0 }
 0x228   :  { %v731_v22 = vpop.eup %730  ;;  %400 = vadd.xlane.f32.xlu1 %v399_v21 }
 0x229   :  { %v402_v23 = vsel %vm341_vm3, %v731_v22, 0.0 }
 0x22a   :  { %v733_v24 = vpop.eup %732  ;;  %403 = vadd.xlane.f32.xlu0 %v402_v23 }
 0x22b   :  { %v405_v25 = vsel %vm341_vm3, %v733_v24, 0.0 }
 0x22c   :  { %v735_v26 = vpop.eup %734  ;;  %406 = vadd.xlane.f32.xlu1 %v405_v25 }
 0x22d   :  { %v408_v27 = vsel %vm341_vm3, %v735_v26, 0.0 }
 0x22e   :  { %v737_v28 = vpop.eup %736  ;;  %409 = vadd.xlane.f32.xlu0 %v408_v27 }
 0x22f   :  { %v411_v29 = vsel %vm341_vm3, %v737_v28, 0.0 }
 0x230   :  { %412 = vadd.xlane.f32.xlu1 %v411_v29 }
 0x2af   :  { %v392_v30 = vpop.xlane.xlu0 %391 }
 0x2b0   :  { %738 = vrcp.f32 %v392_v30 }
 0x2b1   :  { %v395_v31 = vpop.xlane.xlu1 %394 }
 0x2b2   :  { %740 = vrcp.f32 %v395_v31 }
 0x2b3   :  { %v398_v32 = vpop.xlane.xlu0 %397 }
 0x2b4   :  { %742 = vrcp.f32 %v398_v32 }
 0x2b5   :  { %v401_v33 = vpop.xlane.xlu1 %400 }
 0x2b6   :  { %744 = vrcp.f32 %v401_v33 }
 0x2b7   :  { %v404_v34 = vpop.xlane.xlu0 %403 }
 0x2b8   :  { %746 = vrcp.f32 %v404_v34 }
 0x2b9   :  { %v407_v35 = vpop.xlane.xlu1 %406 }
 0x2ba   :  { %v739_v36 = vpop.eup %738  ;;  %748 = vrcp.f32 %v407_v35 }
 0x2bb   :  { %v410_v37 = vpop.xlane.xlu0 %409  ;;  %v422_v40 = vmul.f32 %v739_v36, %v723_v11 }
 0x2bc   :  { %v741_v38 = vpop.eup %740  ;;  %750 = vrcp.f32 %v410_v37 }
 0x2bd   :  { %v413_v39 = vpop.xlane.xlu1 %412  ;;  %v423_v41 = vmul.f32 %v741_v38, %v725_v15 }
 0x2be   :  { %v743_v42 = vpop.eup %742  ;;  %752 = vrcp.f32 %v413_v39 }
 0x2bf   :  { %v430_v43 = vpack.c.bf16 %v423_v41, %v422_v40  ;;  %v424_v46 = vmul.f32 %v743_v42, %v727_v18 }
 0x2c0   :  { %v745_v44 = vpop.eup %744 }
 0x2c1   :  { %v438_v45 = vsel %vm341_vm3, %v430_v43, 0  ;;  %v425_v47 = vmul.f32 %v745_v44, %v729_v20 }
 0x2c2   :  { %v747_v48 = vpop.eup %746  ;;  %689 = vmatpush3.bf16.xpose.msra.mxu0 %v438_v45 }
 0x2c3   :  { %v431_v50 = vpack.c.bf16 %v425_v47, %v424_v46  ;;  %700 = vmatprep.subr.bf16.mxu0 %v860_v0  ;;  %v426_v54 = vmul.f32 %v747_v48, %v731_v22 }
 0x2c4   :  { %v749_v51 = vpop.eup %748 }
 0x2c5   :  { %v484_v52 = vsel %vm341_vm3, %v431_v50, 0  ;;  %v427_v55 = vmul.f32 %v749_v51, %v733_v24 }
 0x2c6   :  { %v751_v56 = vpop.eup %750  ;;  %695 = vmatpush3.bf16.xpose.msra.mxu1 %v484_v52 }
 0x2c7   :  { %v432_v58 = vpack.c.bf16 %v427_v55, %v426_v54  ;;  %706 = vmatprep.subr.bf16.mxu1 %v860_v0  ;;  %v428_v62 = vmul.f32 %v751_v56, %v735_v26 }
 0x2c8   :  { %v753_v59 = vpop.eup %752 }
 0x2c9   :  { %691 = vmatmul.mubr.msk.bf16.vlgmr.msra.gmra.mrb[8].mxu0 %vm341_vm3, %v83_v53  ;;  %v530_v60 = vsel %vm341_vm3, %v432_v58, 0  ;;  %v429_v63 = vmul.f32 %v753_v59, %v737_v28 }
 0x2ca   :  { %701 = vmatpush3.bf16.xpose.msra.mxu0 %v530_v60  ;;  %702 = vmatprep.mubr.msk.bf16.mxu0 %vm861_vm0, %v860_v0 }
 0x2cb   :  { %v433_v2 = vpack.c.bf16 %v429_v63, %v428_v62 }
 0x2cd   :  { %697 = vmatmul.mubr.msk.bf16.vlgmr.msra.gmra.mrb[8].mxu1 %vm341_vm3, %v84_v61  ;;  %v576_v3 = vsel %vm341_vm3, %v433_v2, 0 }
 0x2ce   :  { %707 = vmatpush3.bf16.xpose.msra.mxu1 %v576_v3  ;;  %708 = vmatprep.mubr.msk.bf16.mxu1 %vm861_vm0, %v860_v0 }
 0x2d1   :  { %703 = vmatmul.mubr.msk.bf16.vlgmr.msra.gmra.mrb[12].mxu0 %vm341_vm3, %v85_v4 }
 0x2d5   :  { %709 = vmatmul.mubr.msk.bf16.vlgmr.msra.gmra.mrb[12].mxu1 %vm341_vm3, %v86_v6 }
 0x39c   :  { %v474_v7 = vpop.f32.mrb[8].mxu0 }
 0x39d   :  { %618 = vst.msk [vmem:[#allocation8] sm:$0xff] %vm341_vm3, %v474_v7  ;;  %v692_v8 = vpop.f32.mrb[9].mxu0 }
 0x39e   :  { %v477_v9 = vpop.f32.mrb[10].mxu0 }
 0x39f   :  { %v693_v10 = vpop.f32.mrb[11].mxu0 }
 0x3a0   :  { %v520_v11 = vpop.f32.mrb[8].mxu1 }
 0x3a1   :  { %619 = vst.msk [vmem:[#allocation8 + $0x8] sm:$0xff] %vm341_vm3, %v520_v11  ;;  %v698_v12 = vpop.f32.mrb[9].mxu1 }
 0x3a2   :  { %v523_v13 = vpop.f32.mrb[10].mxu1 }
 0x3a3   :  { %v699_v14 = vpop.f32.mrb[11].mxu1 }
 0x3a4   :  { %v566_v15 = vpop.f32.mrb[12].mxu0 }
 0x3a5   :  { %620 = vst.msk [vmem:[#allocation8 + $0x10] sm:$0xff] %vm341_vm3, %v566_v15  ;;  %v704_v0 = vpop.f32.mrb[13].mxu0 }
 0x3a6   :  { %v569_v16 = vpop.f32.mrb[14].mxu0 }
 0x3a7   :  { %v705_v17 = vpop.f32.mrb[15].mxu0 }
 0x3a8   :  { %v612_v18 = vpop.f32.mrb[12].mxu1 }
 0x3a9   :  { %621 = vst.msk [vmem:[#allocation8 + $0x18] sm:$0xff] %vm341_vm3, %v612_v18  ;;  %v710_v19 = vpop.f32.mrb[13].mxu1 }
 0x3aa   :  { %v615_v20 = vpop.f32.mrb[14].mxu1 }
 0x3ab   :  { %837 = shalt.err (!%p834_p10)
}
 0x3ac   :  { %s838_s7 = scalar_lea.hbm %s1022_s3, 512 }
 0x3ad   :  { %p839_p11 = scmp.ne.s32.totalorder %s1022_s3, %s838_s7  ;;  %p842_p12 = scmp.lt.u32.totalorder %s838_s7, %s1022_s3 }
 0x3af   :  { %p844_p13 = pnand %p842_p12, %p839_p11 }
 0x3b1   :  { %847 = shalt.err (!%p844_p13)
}
 0x3b2   :  { %633 = dma.vmem_to_hbm [thread:$0]  %s628_s18, 512, %s1022_s3, [#allocation4], %s857_s29, %s857_s29, %s858_s30   ;;  %v711_v21 = vpop.f32.mrb[15].mxu1 }
 0x3b3   :  { %852 = dma.done.wait [#allocation4], 512  }
 0x3b4   :  { %853 = vsyncadd [#allocation4], 4294966784 }
 0x3b5   :  { %637 = vsyncpa [#allocation3], 1 }
 0x3b6   :  { %638 = vsyncpa [#allocation6], 1 }
 0x3b7   :  { %639 = vsyncpa [#allocation4], 1 }

</bundles_post_ra>
